<compile_context>
chip_gen: v7x
topology: tpu7x:2x2x1
jax: 0.10.0
libtpu: 0.0.40
codegen_flags: <defaults>
</compile_context>

<pallas_src>
import functools

import jax
import jax.numpy as jnp
from jax.experimental import pallas as pl
from jax.experimental.pallas import tpu as pltpu


def _attn_cls_kernel(rep_ref, mask_ref, q_ref,
                     w1_ref, b1_ref, w2_ref, b2_ref,
                     wkv_ref, wl_ref, bl_ref,
                     logits_ref, attn_ref,
                     *, scale, eps, bb, n, d):
    bf16 = jnp.bfloat16
    f32 = jnp.float32

    # ---- flatten (BB, N, D) -> (BB*N, D): dense MXU rows for the MLP / KV matmuls
    x = rep_ref[...].reshape(bb * n, d).astype(bf16)

    # inp_mlp: Linear(D, H) -> ReLU -> Linear(H, D)    (bf16 inputs, f32 accumulate)
    h = jnp.dot(x, w1_ref[...], preferred_element_type=f32) + b1_ref[...]
    h = jnp.maximum(h, 0.0).astype(bf16)
    xr = (jnp.dot(h, w2_ref[...], preferred_element_type=f32) + b2_ref[...]).astype(bf16)

    # fused K/V projection: one (BB*N, D) @ (D, 2D) matmul, then slice
    kv = jnp.dot(xr, wkv_ref[...], preferred_element_type=f32)          # (BB*N, 2D) f32
    k3 = kv[:, :d].reshape(bb, n, d).astype(bf16)                       # (BB, N, D)
    v3 = kv[:, d:].reshape(bb, n, d).astype(bf16)                       # (BB, N, D)

    # scores: q is batch-invariant (hoisted to wrapper); batched einsum, no .T
    q3 = jnp.broadcast_to(q_ref[...].astype(bf16)[None], (bb, 1, d))    # (BB, 1, D)
    s = jnp.einsum('bqd,bkd->bqk', q3, k3,
                   preferred_element_type=f32) * scale                  # (BB, 1, N)

    masked = (mask_ref[...] != 0)[:, None, :]                           # (BB, 1, N)
    s = jnp.where(masked, -jnp.inf, s)

    # softmax over N (f32) + eps   (rows with at least one unmasked token assumed,
    # same as the PyTorch module)
    m = jnp.max(s, axis=-1, keepdims=True)
    e = jnp.exp(s - m)
    denom = jnp.sum(e, axis=-1, keepdims=True)
    attn3 = e / denom + eps                                             # (BB, 1, N) f32

    # updates: attention-weighted sum of V  -> (BB, D)
    upd3 = jnp.einsum('bqk,bkd->bqd', attn3.astype(bf16), v3,
                      preferred_element_type=f32)                       # (BB, 1, D)
    upd = upd3[:, 0, :]

    # final classifier
    logits = jnp.dot(upd.astype(bf16), wl_ref[...],
                     preferred_element_type=f32) + bl_ref[...]          # (BB, n_out)

    logits_ref[...] = logits
    attn_ref[...] = attn3[:, 0, :]


def attention_based_classifier(representations, mask, params, *, block_b=8):
    """representations: (B, N, D) f32, mask: (B, N) bool (True = masked out).
    Returns (logits (B, n_out) f32, attn (B, N) f32)."""
    B, N, D = representations.shape
    H = params["b1"].shape[-1]
    n_out = params["bl"].shape[-1]
    bf16 = jnp.bfloat16

    # --- hoisted batch-invariant q projection (f32, outside the kernel)
    q = jnp.dot(params["vec"], params["wq"])                            # (1, D)
    # --- fused K/V weights
    wkv = jnp.concatenate([params["wk"], params["wv"]], axis=-1)        # (D, 2D)

    # bf16 weights (MXU-native input dtype, halves weight traffic); biases stay f32
    w1_b, w2_b, wkv_b, wl_b, q_b = (params["w1"].astype(bf16),
                                    params["w2"].astype(bf16),
                                    wkv.astype(bf16),
                                    params["wl"].astype(bf16),
                                    q.astype(bf16))

    # --- batch blocking (pad B up to a multiple of BB; BB multiple of 8 keeps
    #     the (8, 128)-compatible sublane tiling for the 2-D mask/output blocks)
    BB = block_b
    G = pl.cdiv(B, BB)
    B_pad = G * BB
    mask_i = mask.astype(jnp.int32)
    if B_pad != B:
        representations = jnp.pad(representations,
                                  ((0, B_pad - B), (0, 0), (0, 0)))
        mask_i = jnp.pad(mask_i, ((0, B_pad - B), (0, 0)))  # pad rows unmasked -> no NaN

    kernel = functools.partial(_attn_cls_kernel,
                               scale=D ** (-0.5), eps=1e-8, bb=BB, n=N, d=D)

    def fixed(shape):
        nd = len(shape)
        return pl.BlockSpec(shape, lambda b, _nd=nd: (0,) * _nd)

    grid_spec = pltpu.PrefetchScalarGridSpec(
        num_scalar_prefetch=0,
        grid=(G,),
        in_specs=[
            pl.BlockSpec((BB, N, D), lambda b: (b, 0, 0)),   # representations
            pl.BlockSpec((BB, N), lambda b: (b, 0)),         # mask (int32)
            fixed((1, D)),                                   # q (hoisted)
            fixed((D, H)), fixed((1, H)),                    # inp_mlp layer 1
            fixed((H, D)), fixed((1, D)),                    # inp_mlp layer 2
            fixed((D, 2 * D)),                               # fused Wk|Wv
            fixed((D, n_out)), fixed((1, n_out)),            # lin
        ],
        out_specs=[
            pl.BlockSpec((BB, n_out), lambda b: (b, 0)),
            pl.BlockSpec((BB, N), lambda b: (b, 0)),
        ],
    )

    out_shapes = (
        jax.ShapeDtypeStruct((B_pad, n_out), jnp.float32),
        jax.ShapeDtypeStruct((B_pad, N), jnp.float32),
    )

    logits, attn = pl.pallas_call(
        kernel,
        out_shape=out_shapes,
        grid_spec=grid_spec,
        compiler_params=pltpu.CompilerParams(
            # parallel batch axis -> megacore sharding on v7x (2 TCs), neutral on v5e/v6e
            dimension_semantics=("parallel",)),
    )(representations, mask_i, q_b,
      w1_b, params["b1"], w2_b, params["b2"],
      wkv_b, wl_b, params["bl"])

    return logits[:B], attn[:B]


def _reference(representations, mask, params, scale, eps=1e-8):
    """Pure-JAX reference mirroring the kernel's bf16-operand / f32-accumulate dots."""
    bf16, f32 = jnp.bfloat16, jnp.float32

    def mm(a, w):
        return jnp.dot(a.astype(bf16), w.astype(bf16), preferred_element_type=f32)

    h = jnp.maximum(mm(representations, params["w1"]) + params["b1"], 0.0)
    xr = mm(h, params["w2"]) + params["b2"]
    k = mm(xr, params["wk"])
    v = mm(xr, params["wv"])
    q = jnp.dot(params["vec"], params["wq"])                            # f32 (hoisted path)
    dots = jnp.einsum("d,bjd->bj", q[0].astype(bf16), k.astype(bf16),
                      preferred_element_type=f32) * scale
    dots = jnp.where(mask, -jnp.inf, dots)
    m = jnp.max(dots, axis=-1, keepdims=True)
    e = jnp.exp(dots - m)
    attn = e / jnp.sum(e, axis=-1, keepdims=True) + eps
    upd = jnp.einsum("bj,bjd->bd", attn.astype(bf16), v.astype(bf16),
                     preferred_element_type=f32)
    logits = jnp.dot(upd.astype(bf16), params["wl"].astype(bf16),
                     preferred_element_type=f32) + params["bl"]
    return logits, attn


if __name__ == "__main__":
    B, N, D = 10, 8, 32          # B not a multiple of the batch block -> exercises padding
    H, n_out = 64, 4

    key = jax.random.PRNGKey(0)
    ks = jax.random.split(key, 16)

    params = {
        "vec": jax.random.normal(ks[0], (1, D), jnp.float32),
        "w1": jax.random.normal(ks[1], (D, H), jnp.float32) * (1.0 / jnp.sqrt(D)),
        "b1": jax.random.normal(ks[2], (1, H), jnp.float32) * 0.01,
        "w2": jax.random.normal(ks[3], (H, D), jnp.float32) * (1.0 / jnp.sqrt(H)),
        "b2": jax.random.normal(ks[4], (1, D), jnp.float32) * 0.01,
        "wq": jax.random.normal(ks[5], (D, D), jnp.float32) * (1.0 / jnp.sqrt(D)),
        "wk": jax.random.normal(ks[6], (D, D), jnp.float32) * (1.0 / jnp.sqrt(D)),
        "wv": jax.random.normal(ks[7], (D, D), jnp.float32) * (1.0 / jnp.sqrt(D)),
        "wl": jax.random.normal(ks[8], (D, n_out), jnp.float32) * (1.0 / jnp.sqrt(D)),
        "bl": jax.random.normal(ks[9], (1, n_out), jnp.float32) * 0.01,
    }

    representations = jax.random.normal(ks[10], (B, N, D), jnp.float32)
    # mask: True = masked-out position; force at least one unmasked token per row
    mask = jax.random.uniform(ks[11], (B, N)) > 0.7
    mask = mask.at[:, 0].set(False)

    logits, attn = attention_based_classifier(representations, mask, params, block_b=8)
    logits, attn = jax.block_until_ready((logits, attn))

    ref_logits, ref_attn = _reference(representations, mask, params, D ** (-0.5))
    assert logits.shape == (B, n_out) and attn.shape == (B, N)
    assert jnp.allclose(logits, ref_logits, atol=2e-3, rtol=2e-3)
    assert jnp.allclose(attn, ref_attn, atol=1e-3, rtol=1e-3)

    print("KERNEL_OK")
</pallas_src>

<mosaic_0001>
module attributes {stable_mosaic.version = 11 : i64} {
  func.func @_attn_cls_kernel(%arg0: i32, %arg1: memref<8x8x32xf32, #tpu.memory_space<vmem>>, %arg2: memref<8x8xi32, #tpu.memory_space<vmem>>, %arg3: memref<1x32xbf16, #tpu.memory_space<vmem>>, %arg4: memref<32x64xbf16, #tpu.memory_space<vmem>>, %arg5: memref<1x64xf32, #tpu.memory_space<vmem>>, %arg6: memref<64x32xbf16, #tpu.memory_space<vmem>>, %arg7: memref<1x32xf32, #tpu.memory_space<vmem>>, %arg8: memref<32x64xbf16, #tpu.memory_space<vmem>>, %arg9: memref<32x4xbf16, #tpu.memory_space<vmem>>, %arg10: memref<1x4xf32, #tpu.memory_space<vmem>>, %arg11: memref<8x4xf32, #tpu.memory_space<vmem>>, %arg12: memref<8x8xf32, #tpu.memory_space<vmem>>) attributes {dimension_semantics = [#tpu.dimension_semantics<parallel>], iteration_bounds = array<i64: 2>, scalar_prefetch = 0 : i64, scratch_operands = 0 : i64, tpu.core_type = #tpu.core_type<tc>, window_params = [{transform_indices = @transform_0, window_bounds = array<i64: 8, 8, 32>}, {transform_indices = @transform_1, window_bounds = array<i64: 8, 8>}, {pipeline_mode = #tpu.pipeline_mode<synchronous>, transform_indices = @transform_2, window_bounds = array<i64: 1, 32>}, {pipeline_mode = #tpu.pipeline_mode<synchronous>, transform_indices = @transform_3, window_bounds = array<i64: 32, 64>}, {pipeline_mode = #tpu.pipeline_mode<synchronous>, transform_indices = @transform_4, window_bounds = array<i64: 1, 64>}, {pipeline_mode = #tpu.pipeline_mode<synchronous>, transform_indices = @transform_5, window_bounds = array<i64: 64, 32>}, {pipeline_mode = #tpu.pipeline_mode<synchronous>, transform_indices = @transform_6, window_bounds = array<i64: 1, 32>}, {pipeline_mode = #tpu.pipeline_mode<synchronous>, transform_indices = @transform_7, window_bounds = array<i64: 32, 64>}, {pipeline_mode = #tpu.pipeline_mode<synchronous>, transform_indices = @transform_8, window_bounds = array<i64: 32, 4>}, {pipeline_mode = #tpu.pipeline_mode<synchronous>, transform_indices = @transform_9, window_bounds = array<i64: 1, 4>}, {transform_indices = @transform_10, window_bounds = array<i64: 8, 4>}, {transform_indices = @transform_11, window_bounds = array<i64: 8, 8>}]} {
    %c0 = arith.constant 0 : index
    %c0_0 = arith.constant 0 : index
    %c0_1 = arith.constant 0 : index
    %0 = vector.load %arg1[%c0, %c0_0, %c0_1] : memref<8x8x32xf32, #tpu.memory_space<vmem>>, vector<8x8x32xf32>
    %1 = vector.shape_cast %0 : vector<8x8x32xf32> to vector<64x32xf32>
    %2 = arith.truncf %1 : vector<64x32xf32> to vector<64x32xbf16>
    %c0_2 = arith.constant 0 : index
    %c0_3 = arith.constant 0 : index
    %3 = vector.load %arg4[%c0_2, %c0_3] : memref<32x64xbf16, #tpu.memory_space<vmem>>, vector<32x64xbf16>
    %cst = arith.constant dense<0.000000e+00> : vector<64x64xf32>
    %4 = tpu.matmul %2, %3, %cst {dimension_numbers = #tpu.dot_dimension_numbers<[1], [0], [0], [1], [0, 0, 1, 1], [], []>} : vector<64x32xbf16>, vector<32x64xbf16>, vector<64x64xf32> -> vector<64x64xf32>
    %c0_4 = arith.constant 0 : index
    %c0_5 = arith.constant 0 : index
    %5 = vector.load %arg5[%c0_4, %c0_5] : memref<1x64xf32, #tpu.memory_space<vmem>>, vector<1x64xf32>
    %6 = vector.broadcast %5 : vector<1x64xf32> to vector<64x64xf32>
    %7 = arith.addf %4, %6 : vector<64x64xf32>
    %cst_6 = arith.constant 0.000000e+00 : f32
    %8 = vector.broadcast %cst_6 : f32 to vector<64x64xf32>
    %9 = arith.maximumf %7, %8 : vector<64x64xf32>
    %10 = arith.truncf %9 : vector<64x64xf32> to vector<64x64xbf16>
    %c0_7 = arith.constant 0 : index
    %c0_8 = arith.constant 0 : index
    %11 = vector.load %arg6[%c0_7, %c0_8] : memref<64x32xbf16, #tpu.memory_space<vmem>>, vector<64x32xbf16>
    %cst_9 = arith.constant dense<0.000000e+00> : vector<64x32xf32>
    %12 = tpu.matmul %10, %11, %cst_9 {dimension_numbers = #tpu.dot_dimension_numbers<[1], [0], [0], [1], [0, 0, 1, 1], [], []>} : vector<64x64xbf16>, vector<64x32xbf16>, vector<64x32xf32> -> vector<64x32xf32>
    %c0_10 = arith.constant 0 : index
    %c0_11 = arith.constant 0 : index
    %13 = vector.load %arg7[%c0_10, %c0_11] : memref<1x32xf32, #tpu.memory_space<vmem>>, vector<1x32xf32>
    %14 = vector.broadcast %13 : vector<1x32xf32> to vector<64x32xf32>
    %15 = arith.addf %12, %14 : vector<64x32xf32>
    %16 = arith.truncf %15 : vector<64x32xf32> to vector<64x32xbf16>
    %c0_12 = arith.constant 0 : index
    %c0_13 = arith.constant 0 : index
    %17 = vector.load %arg8[%c0_12, %c0_13] : memref<32x64xbf16, #tpu.memory_space<vmem>>, vector<32x64xbf16>
    %cst_14 = arith.constant dense<0.000000e+00> : vector<64x64xf32>
    %18 = tpu.matmul %16, %17, %cst_14 {dimension_numbers = #tpu.dot_dimension_numbers<[1], [0], [0], [1], [0, 0, 1, 1], [], []>} : vector<64x32xbf16>, vector<32x64xbf16>, vector<64x64xf32> -> vector<64x64xf32>
    %19 = vector.extract_strided_slice %18 {offsets = [0, 0], sizes = [64, 32], strides = [1, 1]} : vector<64x64xf32> to vector<64x32xf32>
    %20 = vector.shape_cast %19 : vector<64x32xf32> to vector<8x8x32xf32>
    %21 = arith.truncf %20 : vector<8x8x32xf32> to vector<8x8x32xbf16>
    %22 = vector.extract_strided_slice %18 {offsets = [0, 32], sizes = [64, 32], strides = [1, 1]} : vector<64x64xf32> to vector<64x32xf32>
    %23 = vector.shape_cast %22 : vector<64x32xf32> to vector<8x8x32xf32>
    %24 = arith.truncf %23 : vector<8x8x32xf32> to vector<8x8x32xbf16>
    %c0_15 = arith.constant 0 : index
    %c0_16 = arith.constant 0 : index
    %25 = vector.load %arg3[%c0_15, %c0_16] : memref<1x32xbf16, #tpu.memory_space<vmem>>, vector<1x32xbf16>
    %26 = vector.shape_cast %25 : vector<1x32xbf16> to vector<1x1x32xbf16>
    %27 = vector.shape_cast %26 : vector<1x1x32xbf16> to vector<1x1x32xbf16>
    %28 = vector.broadcast %27 : vector<1x1x32xbf16> to vector<8x1x32xbf16>
    "tpu.trace_start"() <{level = 10 : i32, message = "bqd,bkd->bqk"}> : () -> ()
    %cst_17 = arith.constant dense<0.000000e+00> : vector<8x1x8xf32>
    %29 = tpu.matmul %28, %21, %cst_17 {dimension_numbers = #tpu.dot_dimension_numbers<[2], [2], [1], [1], [0, 0, 0, 1, 1, 1], [0], [0]>} : vector<8x1x32xbf16>, vector<8x8x32xbf16>, vector<8x1x8xf32> -> vector<8x1x8xf32>
    "tpu.trace_stop"() : () -> ()
    %cst_18 = arith.constant 0.176776692 : f32
    %30 = vector.broadcast %cst_18 : f32 to vector<8x1x8xf32>
    %31 = arith.mulf %29, %30 : vector<8x1x8xf32>
    %c0_19 = arith.constant 0 : index
    %c0_20 = arith.constant 0 : index
    %32 = vector.load %arg2[%c0_19, %c0_20] : memref<8x8xi32, #tpu.memory_space<vmem>>, vector<8x8xi32>
    %c0_i32 = arith.constant 0 : i32
    %33 = vector.broadcast %c0_i32 : i32 to vector<8x8xi32>
    %34 = arith.cmpi ne, %32, %33 : vector<8x8xi32>
    %35 = vector.shape_cast %34 : vector<8x8xi1> to vector<8x1x8xi1>
    %cst_21 = arith.constant 0xFF800000 : f32
    %36 = vector.broadcast %cst_21 : f32 to vector<8x1x8xf32>
    %37 = arith.select %35, %36, %31 : vector<8x1x8xi1>, vector<8x1x8xf32>
    %cst_22 = arith.constant dense<0xFF800000> : vector<8x1xf32>
    %38 = vector.multi_reduction <maximumf>, %37, %cst_22 [2] : vector<8x1x8xf32> to vector<8x1xf32>
    %39 = vector.shape_cast %38 : vector<8x1xf32> to vector<8x1x1xf32>
    %40 = vector.broadcast %39 : vector<8x1x1xf32> to vector<8x1x8xf32>
    %41 = arith.subf %37, %40 : vector<8x1x8xf32>
    %42 = math.exp %41 : vector<8x1x8xf32>
    %cst_23 = arith.constant dense<0.000000e+00> : vector<8x1xf32>
    %43 = vector.multi_reduction <add>, %42, %cst_23 [2] : vector<8x1x8xf32> to vector<8x1xf32>
    %44 = vector.shape_cast %43 : vector<8x1xf32> to vector<8x1x1xf32>
    %45 = vector.broadcast %44 : vector<8x1x1xf32> to vector<8x1x8xf32>
    %46 = arith.divf %42, %45 : vector<8x1x8xf32>
    %cst_24 = arith.constant 9.99999993E-9 : f32
    %47 = vector.broadcast %cst_24 : f32 to vector<8x1x8xf32>
    %48 = arith.addf %46, %47 : vector<8x1x8xf32>
    %49 = arith.truncf %48 : vector<8x1x8xf32> to vector<8x1x8xbf16>
    "tpu.trace_start"() <{level = 10 : i32, message = "bqk,bkd->bqd"}> : () -> ()
    %cst_25 = arith.constant dense<0.000000e+00> : vector<8x1x32xf32>
    %50 = tpu.matmul %49, %24, %cst_25 {dimension_numbers = #tpu.dot_dimension_numbers<[2], [1], [1], [2], [0, 0, 0, 1, 1, 2], [0], [0]>} : vector<8x1x8xbf16>, vector<8x8x32xbf16>, vector<8x1x32xf32> -> vector<8x1x32xf32>
    "tpu.trace_stop"() : () -> ()
    %51 = vector.shape_cast %50 : vector<8x1x32xf32> to vector<8x32xf32>
    %52 = arith.truncf %51 : vector<8x32xf32> to vector<8x32xbf16>
    %c0_26 = arith.constant 0 : index
    %c0_27 = arith.constant 0 : index
    %53 = vector.load %arg9[%c0_26, %c0_27] : memref<32x4xbf16, #tpu.memory_space<vmem>>, vector<32x4xbf16>
    %cst_28 = arith.constant dense<0.000000e+00> : vector<8x4xf32>
    %54 = tpu.matmul %52, %53, %cst_28 {dimension_numbers = #tpu.dot_dimension_numbers<[1], [0], [0], [1], [0, 0, 1, 1], [], []>} : vector<8x32xbf16>, vector<32x4xbf16>, vector<8x4xf32> -> vector<8x4xf32>
    %c0_29 = arith.constant 0 : index
    %c0_30 = arith.constant 0 : index
    %55 = vector.load %arg10[%c0_29, %c0_30] : memref<1x4xf32, #tpu.memory_space<vmem>>, vector<1x4xf32>
    %56 = vector.broadcast %55 : vector<1x4xf32> to vector<8x4xf32>
    %57 = arith.addf %54, %56 : vector<8x4xf32>
    %c0_31 = arith.constant 0 : index
    %c0_32 = arith.constant 0 : index
    %58 = vector.load %arg11[%c0_31, %c0_32] : memref<8x4xf32, #tpu.memory_space<vmem>>, vector<8x4xf32>
    tpu.vector_store %arg11[%c0_31, %c0_32], %57 {strides = array<i32>} : memref<8x4xf32, #tpu.memory_space<vmem>>, vector<8x4xf32>,
    %59 = vector.shape_cast %48 : vector<8x1x8xf32> to vector<8x8xf32>
    %c0_33 = arith.constant 0 : index
    %c0_34 = arith.constant 0 : index
    %60 = vector.load %arg12[%c0_33, %c0_34] : memref<8x8xf32, #tpu.memory_space<vmem>>, vector<8x8xf32>
    tpu.vector_store %arg12[%c0_33, %c0_34], %59 {strides = array<i32>} : memref<8x8xf32, #tpu.memory_space<vmem>>, vector<8x8xf32>,
    return
  }
  func.func @transform_0(%arg0: i32) -> (i32, i32, i32) {
    %c0_i32 = arith.constant 0 : i32
    %c0_i32_0 = arith.constant 0 : i32
    %c0_i32_1 = arith.constant 0 : i32
    return %arg0, %c0_i32, %c0_i32_0 : i32, i32, i32
  }
  func.func @transform_1(%arg0: i32) -> (i32, i32) {
    %c0_i32 = arith.constant 0 : i32
    %c0_i32_0 = arith.constant 0 : i32
    return %arg0, %c0_i32 : i32, i32
  }
  func.func @transform_2(%arg0: i32) -> (i32, i32) {
    %c0_i32 = arith.constant 0 : i32
    %c0_i32_0 = arith.constant 0 : i32
    %c0_i32_1 = arith.constant 0 : i32
    return %c0_i32, %c0_i32_0 : i32, i32
  }
  func.func @transform_3(%arg0: i32) -> (i32, i32) {
    %c0_i32 = arith.constant 0 : i32
    %c0_i32_0 = arith.constant 0 : i32
    %c0_i32_1 = arith.constant 0 : i32
    return %c0_i32, %c0_i32_0 : i32, i32
  }
  func.func @transform_4(%arg0: i32) -> (i32, i32) {
    %c0_i32 = arith.constant 0 : i32
    %c0_i32_0 = arith.constant 0 : i32
    %c0_i32_1 = arith.constant 0 : i32
    return %c0_i32, %c0_i32_0 : i32, i32
  }
  func.func @transform_5(%arg0: i32) -> (i32, i32) {
    %c0_i32 = arith.constant 0 : i32
    %c0_i32_0 = arith.constant 0 : i32
    %c0_i32_1 = arith.constant 0 : i32
    return %c0_i32, %c0_i32_0 : i32, i32
  }
  func.func @transform_6(%arg0: i32) -> (i32, i32) {
    %c0_i32 = arith.constant 0 : i32
    %c0_i32_0 = arith.constant 0 : i32
    %c0_i32_1 = arith.constant 0 : i32
    return %c0_i32, %c0_i32_0 : i32, i32
  }
  func.func @transform_7(%arg0: i32) -> (i32, i32) {
    %c0_i32 = arith.constant 0 : i32
    %c0_i32_0 = arith.constant 0 : i32
    %c0_i32_1 = arith.constant 0 : i32
    return %c0_i32, %c0_i32_0 : i32, i32
  }
  func.func @transform_8(%arg0: i32) -> (i32, i32) {
    %c0_i32 = arith.constant 0 : i32
    %c0_i32_0 = arith.constant 0 : i32
    %c0_i32_1 = arith.constant 0 : i32
    return %c0_i32, %c0_i32_0 : i32, i32
  }
  func.func @transform_9(%arg0: i32) -> (i32, i32) {
    %c0_i32 = arith.constant 0 : i32
    %c0_i32_0 = arith.constant 0 : i32
    %c0_i32_1 = arith.constant 0 : i32
    return %c0_i32, %c0_i32_0 : i32, i32
  }
  func.func @transform_10(%arg0: i32) -> (i32, i32) {
    %c0_i32 = arith.constant 0 : i32
    %c0_i32_0 = arith.constant 0 : i32
    return %arg0, %c0_i32 : i32, i32
  }
  func.func @transform_11(%arg0: i32) -> (i32, i32) {
    %c0_i32 = arith.constant 0 : i32
    %c0_i32_0 = arith.constant 0 : i32
    return %arg0, %c0_i32 : i32, i32
  }
}

</mosaic_0001>

<bundles_post_ra>
// kernel: tpu_custom_call.1
= control target key start
LH: loop header
LB: loop body
LE: loop exit
PB: predicated region body
PF: predicated region fallthrough
CT: control target
= control target key end

     0   :  { %17 = vsyncpa [#allocation3], 0  ;;  %s2856_s0 = inlined_call_operand.hbm [shape: f32[16,8,32], index: 0, kind: input, shape index: {}]   ;;  %s2857_s1 = inlined_call_operand.vmem [shape: s32[16,8], index: 1, kind: input, shape index: {}]   ;;  %s2858_s2 = inlined_call_operand.vmem [shape: bf16[1,32], index: 2, kind: input, shape index: {}]   ;;  %s2859_s3 = inlined_call_operand.vmem [shape: bf16[32,64], index: 3, kind: input, shape index: {}]   ;;  %s2860_s4 = inlined_call_operand.vmem [shape: f32[1,64], index: 4, kind: input, shape index: {}]   ;;  %s2861_s5 = inlined_call_operand.vmem [shape: bf16[64,32], index: 5, kind: input, shape index: {}]   ;;  %s2862_s6 = inlined_call_operand.vmem [shape: f32[1,32], index: 6, kind: input, shape index: {}]   ;;  %s2863_s7 = inlined_call_operand.vmem [shape: bf16[32,64], index: 7, kind: input, shape index: {}]   ;;  %s2864_s8 = inlined_call_operand.vmem [shape: bf16[32,4], index: 8, kind: input, shape index: {}]   ;;  %s2865_s9 = inlined_call_operand.vmem [shape: f32[1,4], index: 9, kind: input, shape index: {}]   ;;  %s2866_s10 = inlined_call_operand.vmem [shape: f32[16,4], index: 10, kind: output, shape index: {0}]   ;;  %s2867_s11 = inlined_call_operand.vmem [shape: f32[16,8], index: 11, kind: output, shape index: {1}]  }
   0x1   :  { %19 = vsyncpa [#allocation3 + $0x1], 0  ;;  %s2463_s17 = smov 0   ;;  %s2465_s18 = smov 0  }
   0x2   :  { %s2467_s19 = smov 0   ;;  %s2469_s20 = smov 0  }
   0x3 LB: > { %s2482_s21 = sadd.s32 4294967295, %s2393_s20   ;;  %s2485_s22 = sadd.s32 1, %s2393_s20   ;;  %s2393_s20 = sphi %s2469_s20, %s2874_s20   ;;  %s2389_s19 = sphi %s2467_s19, %s2873_s19   ;;  %s2385_s18 = sphi %s2465_s18, %s2872_s18   ;;  %s2381_s17 = sphi %s2463_s17, %s2871_s17  }
   0x4   : > { %s29_s23 = ssub.s32 %s2393_s20, %s2485_s22  ;;  %s32_s24 = sadd.s32 1, %s2389_s19 }
   0x5   : > { %p30_p0 = scmp.eq.s32.totalorder %s29_s23, 0  ;;  %p39_p1 = scmp.ne.s32.totalorder %s2389_s19, %s2385_s18 }
   0x6   : > { %p40_p2 = scmp.eq.s32.totalorder %s2393_s20, 0  ;;  %p45_p3 = scmp.ne.s32.totalorder %s2385_s18, %s2381_s17 }
   0x7   : > { %s2495_s25 = scalar_select %p30_p0, %s2389_s19, %s32_s24  }
   0x8   : > { %p41_p4 = por %p40_p2, %p39_p1  ;;  %p46_p5 = scmp.eq.s32.totalorder %s2482_s21, 0 }
   0x9   : > { %p2247_p6 = scmp.lt.s32.totalorder %s2393_s20, 2  ;;  %s339_s27 = sand.u32 1, %s2389_s19  }
   0xa   : > { %p2499_p7 = por %p46_p5, %p45_p3  ;;  %s1989_s28 = sshll.u32 %s339_s27, 6 }
   0xb   : > { %s2041_s29 = sshll.u32 %s2393_s20, 10  ;;  %s343_s14 = scalar_lea.vmem [#allocation2], %s1989_s28 }
   0xc   : > { %s2508_s13 = scalar_lea.hbm %s2856_s0, %s2041_s29  ;;  %s350_s15 = sshll.u32 %s343_s14, 4  ;;  %s2510_s15 = int_to_ptr.vmem [resolvable:$true] %s350_s15 }
   0xd   : > { %p2512_p8 = pnand %p2247_p6, %p41_p4  ;;  %s2517_s17 = scalar_lea.sflag [#allocation3], %s339_s27 }
   0xe   : > { %s2329_s23 = scalar_lea.hbm %s2508_s13, 1024  ;;  %s2334_s29 = scalar_lea.hbm %s2856_s0, 2048 }
   0xf   : > { %p2330_p10 = scmp.ne.s32.totalorder %s2508_s13, %s2329_s23  ;;  %p2331_p11 = pneg %p2512_p8 }
  0x10   : > { %p2335_p0 = scmp.lt.u32.totalorder %s2508_s13, %s2856_s0  ;;  %p2336_p1 = scmp.lt.u32.totalorder %s2334_s29, %s2329_s23 }
  0x11   : > { %p2332_p12 = pnand %p2331_p11, %p2330_p10  ;;  %p2338_p3 = scmp.lt.u32.totalorder %s2329_s23, %s2508_s13 }
  0x12   : > { %p2337_p2 = por %p2336_p1, %p2335_p0 }
  0x13   : > { %p2333_p13 = pneg %p2332_p12 }
  0x14   : > { %p2339_p4 = por %p2338_p3, %p2337_p2 }
  0x16   : > { %p2340_p5 = pnand %p2339_p4, %p2333_p13 }
  0x18   : > { %2343 = shalt.err (!%p2340_p5)
}
  0x19   : > { %s2344_s27 = scalar_lea.vmem %s2510_s15, 1024  ;;  %s2395_s14 = smov [#allocation2]  }
  0x1a   : > { %p2345_p6 = scmp.ne.s32.totalorder %s2510_s15, %s2344_s27  ;;  %s2349_s24 = sshll.u32 %s2395_s14, 4  ;;  %s2350_s24 = int_to_ptr.vmem [resolvable:$false] %s2349_s24 }
  0x1b   : > { %s2351_s28 = scalar_lea.vmem %s2350_s24, 2048  ;;  %p2352_p9 = scmp.lt.s32.totalorder %s2510_s15, %s2350_s24 }
  0x1c   : > { %p2347_p10 = pnand %p2345_p6, %p2331_p11  ;;  %p2353_p0 = scmp.lt.s32.totalorder %s2351_s28, %s2344_s27 }
  0x1e   : > { %p2348_p12 = pneg %p2347_p10  ;;  %p2354_p1 = por %p2353_p0, %p2352_p9 }
  0x20   : > { %p2355_p2 = pnand %p2354_p1, %p2348_p12 }
  0x22   : > { %2358 = shalt.err (!%p2355_p2)
}
  0x23   : > { %s2396_s23 = smov 128   ;;  %s2397_s29 = smov 8  }
  0x24   : > { %2246 = dma.hbm_to_vmem [thread:$0]  (!%p2512_p8), %s2508_s13, 1024, %s2510_s15, %s2517_s17, %s2396_s23, %s2396_s23, %s2397_s29  }
  0x25   : > { %p365_p11 = scmp.lt.s32.totalorder %s2393_s20, 3  ;;  %p2870_p13 = scmp.ge.s32.totalorder %s2393_s20, 1 }
  0x27   : > { %p366_p3 = pnand %p2870_p13, %p365_p11 }
  0x28   : > { %s371_s30 = sand.u32 (!%p366_p3), 1, %s2385_s18  }
  0x29   : > { %369 = sbr.rel (%p366_p3) target bundleno = 1767 (0x6e7), region = 60  ;;  %s1993_s12 = sshll.u32 (!%p366_p3), %s371_s30, 6 }
  0x2a   : > { %s372_s27 = scalar_lea.sflag (!%p366_p3), [#allocation3], %s371_s30  ;;  %s375_s14 = scalar_lea.vmem (!%p366_p3), [#allocation2], %s1993_s12 }
  0x30   : > { %2376 = dma.done.wait (%p2499_p7), %s372_s27, 1024  }
  0x31   : > { %2378 = vsyncadd (%p2499_p7), %s372_s27, 4294966272  ;;  %v2287_v0 = vld [vmem:[%s2859_s3] sm:$0xff]   ;;  %v2288_v1 = vld [vmem:[%s2859_s3 + $0x8] sm:$0xff]   ;;  %vm470_vm0 = vcmask 261120   ;;  %vm599_vm1 = vcmask 523264   ;;  %vm2399_vm2 = vmmov 0  }
  0x32   : > { %2097 = vmatprep.subr.bf16.mxu0 %v2287_v0  ;;  %v435_v2 = vld [vmem:[%s375_s14] sm:$0xff]  ;;  %v436_v3 = vld [vmem:[%s375_s14 + $0x8] sm:$0xff]  ;;  %v437_v5 = vld [vmem:[%s375_s14 + $0x10] sm:$0xff]  ;;  %p422_p7 = scmp.lt.s32.totalorder %s2482_s21, 1  ;;  %vm1206_vm5 = vcmask 57344   ;;  %vm1318_vm13 = vcmask 1043456  }
  0x33   : > { %2098 = vmatpush3.bf16.msra.mxu0 %v2287_v0  ;;  %v443_v4 = vpack.c.bf16 %v436_v3, %v435_v2  ;;  %v438_v6 = vld [vmem:[%s375_s14 + $0x18] sm:$0xff]  ;;  %v439_v7 = vld [vmem:[%s375_s14 + $0x20] sm:$0xff]  ;;  %v440_v8 = vld [vmem:[%s375_s14 + $0x28] sm:$0xff]  ;;  %vm1314_vm14 = vcmask 64512   ;;  %vm1741_vm15 = vcmask 1041409  }
  0x34   : > { %2099 = vmatprep.subr.bf16.mxu0 %v2288_v1  ;;  %v2289_v9 = vld [vmem:[%s2861_s5] sm:$0xff]   ;;  %v444_v10 = vpack.c.bf16 %v438_v6, %v437_v5  ;;  %v2290_v11 = vld [vmem:[%s2861_s5 + $0x8] sm:$0xff]   ;;  %v445_v12 = vpack.c.bf16 %v440_v8, %v439_v7  ;;  %v441_v13 = vld [vmem:[%s375_s14 + $0x30] sm:$0xff]  ;;  %v2398_v6 = vmov 0.0   ;;  %s2876_s21 = smov (!%p422_p7, %s2482_s21), 1 }
  0x35   : > { %2101 = vmatprep.mubr.msk.bf16.mxu0 %vm470_vm0, %v443_v4  ;;  %2109 = vmatprep.subr.bf16.mxu1 %v2289_v9  ;;  %v442_v14 = vld [vmem:[%s375_s14 + $0x38] sm:$0xff]  ;;  %v2291_v16 = vld [vmem:[%s2861_s5 + $0x10] sm:$0xff]   ;;  %v1997_v18 = vld [vmem:[%s2860_s4] ss:$0 sm:$0xff]  ;;  %s2670_s23 = sshll.u32 %s2876_s21, 3  ;;  %s2402_s21 = smov 96  }
  0x36   : > { %2110 = vmatpush3.bf16.msra.mxu1 %v2289_v9  ;;  %v446_v15 = vpack.c.bf16 %v442_v14, %v441_v13  ;;  %v2292_v17 = vld [vmem:[%s2861_s5 + $0x18] sm:$0xff]   ;;  %v2293_v47 = vld [vmem:[%s2863_s7] sm:$0xff]   ;;  %v2294_v48 = vld [vmem:[%s2863_s7 + $0x8] sm:$0xff]   ;;  %s425_s12 = scalar_lea.vmem %s2857_s1, %s2670_s23  ;;  %s433_s14 = scalar_lea.vmem %s2867_s11, %s2670_s23 }
  0x37   : > { %2100 = vmatpush3.bf16.msra.mxu0 %v2288_v1  ;;  %2111 = vmatprep.subr.bf16.mxu1 %v2290_v11  ;;  %v2004_v50 = vld [vmem:[%s2862_s6] ss:$0 sm:$0xff]  ;;  %s429_s30 = scalar_lea.vmem %s2866_s10, %s2670_s23 }
  0x38   : > { %2125 = vmatprep.subr.bf16.mxu0 %v2293_v47 }
  0x3a   : > { %2102 = vmatmul.mubr.msk.bf16.vlgmr.msra.gmra.mrb[0].mxu0 %vm470_vm0, %v444_v10  ;;  %2112 = vmatpush3.bf16.msra.mxu1 %v2290_v11 }
  0x3b   : > { %2105 = vmatprep.mubr.msk.bf16.mxu0 %vm470_vm0, %v445_v12  ;;  %2113 = vmatprep.subr.bf16.mxu1 %v2291_v16 }
  0x3c   : > { %2126 = vmatpush3.bf16.msra.mxu0 %v2293_v47 }
  0x3d   : > { %2127 = vmatprep.subr.bf16.mxu0 %v2294_v48 }
  0x3e   : > { %2114 = vmatpush3.bf16.msra.mxu1 %v2291_v16 }
  0x3f   : > { %2115 = vmatprep.subr.bf16.mxu1 %v2292_v17 }
  0x40   : > { %2128 = vmatpush3.bf16.msra.mxu0 %v2294_v48 }
  0x41   : > { %2143 = vmatprep.subr.bf16.mxu0 %v2398_v6 }
  0x42   : > { %2106 = vmatmul.mubr.msk.bf16.gmra.mrb[4].mxu0 %vm470_vm0, %v446_v15  ;;  %2116 = vmatpush3.bf16.msra.mxu1 %v2292_v17  ;;  %v782_v17 = vld [vmem:[%s2858_s2] sm:$0x1] }
  0x43   : > { %2137 = vmatprep.subr.bf16.mxu1 %v2398_v6 }
 0x10d   : > { %v2103_v19 = vpop.f32.mrb[0].mxu0 }
 0x10e   : > { %v526_v20 = vadd.f32 %v2103_v19, %v1997_v18  ;;  %v517_v21 = vpop.f32.mrb[1].mxu0 }
 0x10f   : > { %v518_v22 = vadd.f32 %v1997_v18, %v517_v21  ;;  %v2104_v23 = vpop.f32.mrb[2].mxu0 }
 0x110   : > { %v529_v24 = vadd.f32 %v2104_v23, %v1997_v18  ;;  %v520_v25 = vpop.f32.mrb[3].mxu0  ;;  %v550_v27 = vmax.f32 %v526_v20, 0.0 }
 0x111   : > { %v521_v26 = vadd.f32 %v1997_v18, %v520_v25  ;;  %v548_v29 = vmax.f32 %v518_v22, 0.0 }
 0x112   : > { %v551_v28 = vmax.f32 %v529_v24, 0.0 }
 0x113   : > { %v549_v30 = vmax.f32 %v521_v26, 0.0 }
 0x114   : > { %v557_v31 = vpack.c.bf16 %v551_v28, %v550_v27 }
 0x115   : > { %v556_v32 = vpack.c.bf16 %v549_v30, %v548_v29  ;;  %v2107_v33 = vpop.f32.mrb[4].mxu0 }
 0x116   : > { %v542_v34 = vadd.f32 %v2107_v33, %v1997_v18  ;;  %v533_v35 = vpop.f32.mrb[5].mxu0 }
 0x117   : > { %2117 = vmatprep.mubr.msk.bf16.mxu1 %vm599_vm1, %v556_v32  ;;  %v534_v36 = vadd.f32 %v1997_v18, %v533_v35  ;;  %v2108_v37 = vpop.f32.mrb[6].mxu0  ;;  %v2400_v32 = vmov 1966171168   ;;  %v1138_v35 = vld [vmem:[%s425_s12] sm:$0xff] }
 0x118   : > { %2118 = vmatmul.mubr.msk.bf16.vlgmr.msra.gmra.mrb[0].mxu1 %vm599_vm1, %v557_v31  ;;  %v554_v38 = vmax.f32 %v542_v34, 0.0  ;;  %v545_v39 = vadd.f32 %v2108_v37, %v1997_v18  ;;  %v536_v40 = vpop.f32.mrb[7].mxu0  ;;  %v1143_v33 = vunpack.c.l.s4 %v2400_v32  ;;  %v1145_v34 = vlaneseq }
 0x119   : > { %v552_v41 = vmax.f32 %v534_v36, 0.0  ;;  %v537_v42 = vadd.f32 %v1997_v18, %v536_v40  ;;  %vm1139_vm3 = vcmp.ne.s32.totalorder %v1138_v35, 0 }
 0x11a   : > { %v555_v43 = vmax.f32 %v545_v39, 0.0  ;;  %v1144_v36 = vunpack.c.0.s8 %v1143_v33  ;;  %v1146_v37 = vshrl.u32 %v1145_v34, 7  ;;  %v2401_v39 = vmov 0  }
 0x11b   : > { %v553_v44 = vmax.f32 %v537_v42, 0.0  ;;  %v1140_v40 = vsel %vm1139_vm3, 1, %v2401_v39  ;;  %vm1750_vm3 = vcmask 1044484  }
 0x11c   : > { %v559_v45 = vpack.c.bf16 %v555_v43, %v554_v38  ;;  %v2676_v38 = vsub.s32 %v1144_v36, %v1146_v37 }
 0x11d   : > { %v558_v46 = vpack.c.bf16 %v553_v44, %v552_v41 }
 0x11e   : > { %v1148_v41 = vrot.slane %v1140_v40, %v2676_v38 }
 0x11f   : > { %2121 = vmatprep.mubr.msk.bf16.mxu1 %vm599_vm1, %v558_v46 }
 0x120   : > { %2122 = vmatmul.mubr.msk.bf16.gmra.mrb[4].mxu1 %vm599_vm1, %v559_v45  ;;  %v1156_v42 = vcombine.high %v1148_v41, %v1148_v41  ;;  %v1164_v43 = vrot.slane %v1148_v41, %v2676_v38  ;;  %vm1744_vm1 = vcmask 1042434  }
 0x121   : > { %2139 = vmatprep.mubr.msk.bf16.mxu1 %vm2399_vm2, %v2398_v6 }
 0x122   : > { %v1178_v44 = vrot.slane %v1156_v42, %v2676_v38  ;;  %vm1190_vm4 = vcmp.ne.s32.totalorder %v1164_v43, 0 }
 0x124   : > { %vm1191_vm6 = vcmp.ne.s32.totalorder %v1178_v44, 0 }
 0x1eb   : > { %v2119_v49 = vpop.f32.mrb[0].mxu1 }
 0x1ec   : > { %v646_v51 = vpop.f32.mrb[1].mxu1  ;;  %v655_v53 = vadd.f32 %v2119_v49, %v2004_v50  ;;  %v1141_v49 = vcombine.high %v1140_v40, %v1140_v40 }
 0x1ed   : > { %v2120_v52 = vpop.f32.mrb[2].mxu1  ;;  %v647_v56 = vadd.f32 %v2004_v50, %v646_v51 }
 0x1ee   : > { %v658_v54 = vadd.f32 %v2120_v52, %v2004_v50  ;;  %v649_v55 = vpop.f32.mrb[3].mxu1 }
 0x1ef   : > { %v650_v57 = vadd.f32 %v2004_v50, %v649_v55 }
 0x1f0   : > { %v678_v58 = vpack.c.bf16 %v658_v54, %v655_v53 }
 0x1f1   : > { %v677_v59 = vpack.c.bf16 %v650_v57, %v647_v56  ;;  %v1186_v57 = vcombine.high %v1164_v43, %v1164_v43 }
 0x1f3   : > { %2129 = vmatprep.mubr.msk.bf16.mxu0 %vm470_vm0, %v677_v59  ;;  %v2123_v60 = vpop.f32.mrb[4].mxu1  ;;  %vm1192_vm7 = vcmp.ne.s32.totalorder %v1186_v57, 0 }
 0x1f4   : > { %2130 = vmatmul.mubr.msk.bf16.vlgmr.msra.gmra.mrb[8].mxu0 %vm470_vm0, %v678_v58  ;;  %v671_v61 = vadd.f32 %v2123_v60, %v2004_v50  ;;  %v662_v62 = vpop.f32.mrb[5].mxu1  ;;  %v1188_v60 = vcombine.high %v1178_v44, %v1178_v44 }
 0x1f5   : > { %v663_v63 = vadd.f32 %v2004_v50, %v662_v62  ;;  %v2124_v0 = vpop.f32.mrb[6].mxu1 }
 0x1f6   : > { %v674_v1 = vadd.f32 %v2124_v0, %v2004_v50  ;;  %v665_v2 = vpop.f32.mrb[7].mxu1  ;;  %vm1193_vm8 = vcmp.ne.s32.totalorder %v1188_v60, 0 }
 0x1f7   : > { %v666_v3 = vadd.f32 %v2004_v50, %v665_v2 }
 0x1f8   : > { %v680_v4 = vpack.c.bf16 %v674_v1, %v671_v61  ;;  %v1155_v61 = vrot.slane %v1141_v49, %v2676_v38 }
 0x1f9   : > { %v679_v5 = vpack.c.bf16 %v666_v3, %v663_v63 }
 0x1fb   : > { %2133 = vmatprep.mubr.msk.bf16.mxu0 %vm470_vm0, %v679_v5 }
 0x1fc   : > { %2134 = vmatmul.mubr.msk.bf16.gmra.mrb[12].mxu0 %vm470_vm0, %v680_v4  ;;  %v1157_v4 = vcombine.high %v1155_v61, %v1155_v61 }
 0x1fd   : > { %2145 = vmatprep.mubr.msk.bf16.mxu0 %vm2399_vm2, %v2398_v6 }
 0x2c7   : > { %v2131_v7 = vpop.f32.mrb[8].mxu0 }
 0x2c8   : > { %v743_v8 = vpop.f32.mrb[9].mxu0  ;;  %v2610_v15 = vpack.c.bf16 %v2131_v7, %v2131_v7 }
 0x2c9   : > { %v2601_v9 = vpack.c.bf16 %v743_v8, %v743_v8  ;;  %v2132_v10 = vpop.f32.mrb[10].mxu0 }
 0x2ca   : > { %v746_v11 = vpop.f32.mrb[11].mxu0  ;;  %v2616_v19 = vpack.c.bf16 %v2132_v10, %v2132_v10  ;;  %v873_v22 = vsel %vm470_vm0, %v2610_v15, 0 }
 0x2cb   : > { %v787_v12 = vsel %vm470_vm0, %v2601_v9, 0  ;;  %v2605_v13 = vpack.c.bf16 %v746_v11, %v746_v11 }
 0x2cc   : > { %2138 = vmatpush3.bf16.xpose.msra.mxu1 %v787_v12  ;;  %v916_v23 = vsel %vm470_vm0, %v2616_v19, 0 }
 0x2cd   : > { %v830_v14 = vsel %vm470_vm0, %v2605_v13, 0  ;;  %2149 = vmatprep.subr.bf16.mxu1 %v2398_v6 }
 0x2ce   : > { %2144 = vmatpush3.bf16.xpose.msra.mxu0 %v830_v14  ;;  %v1171_v14 = vrot.slane %v1155_v61, %v2676_v38 }
 0x2cf   : > { %v2135_v16 = vpop.f32.mrb[12].mxu0  ;;  %2155 = vmatprep.subr.bf16.mxu0 %v2398_v6 }
 0x2d0   : > { %v759_v18 = vpop.f32.mrb[13].mxu0  ;;  %v2645_v28 = vpack.c.bf16 %v2135_v16, %v2135_v16  ;;  %vm1194_vm9 = vcmp.ne.s32.totalorder %v1171_v14, 0  ;;  %v1187_v36 = vcombine.high %v1171_v14, %v1171_v14 }
 0x2d1   : > { %v2136_v20 = vpop.f32.mrb[14].mxu0  ;;  %v2629_v24 = vpack.c.bf16 %v759_v18, %v759_v18  ;;  %v1185_v18 = vrot.slane %v1157_v4, %v2676_v38 }
 0x2d2   : > { %v762_v21 = vpop.f32.mrb[15].mxu0  ;;  %v2648_v29 = vpack.c.bf16 %v2136_v20, %v2136_v20  ;;  %v1045_v30 = vsel %vm470_vm0, %v2645_v28, 0  ;;  %vm1196_vm11 = vcmp.ne.s32.totalorder %v1187_v36, 0 }
 0x2d3   : > { %2140 = vmatmul.mubr.msk.bf16.vlgmr.msra.gmra.mrb[8].mxu1 %vm470_vm0, %v782_v17  ;;  %v2632_v25 = vpack.c.bf16 %v762_v21, %v762_v21  ;;  %v959_v26 = vsel %vm470_vm0, %v2629_v24, 0  ;;  %vm1195_vm10 = vcmp.ne.s32.totalorder %v1185_v18, 0 }
 0x2d4   : > { %2150 = vmatpush3.bf16.xpose.msra.mxu1 %v873_v22  ;;  %2151 = vmatprep.mubr.msk.bf16.mxu1 %vm2399_vm2, %v2398_v6  ;;  %v1088_v31 = vsel %vm470_vm0, %v2648_v29, 0 }
 0x2d5   : > { %2146 = vmatmul.mubr.msk.bf16.vlgmr.msra.gmra.mrb[16].mxu0 %vm470_vm0, %v782_v17  ;;  %2161 = vmatprep.subr.bf16.mxu1 %v2398_v6  ;;  %v1002_v27 = vsel %vm470_vm0, %v2632_v25, 0 }
 0x2d6   : > { %2156 = vmatpush3.bf16.xpose.msra.mxu0 %v916_v23  ;;  %2157 = vmatprep.mubr.msk.bf16.mxu0 %vm2399_vm2, %v2398_v6 }
 0x2d7   : > { %2167 = vmatprep.subr.bf16.mxu0 %v2398_v6 }
 0x2db   : > { %2152 = vmatmul.mubr.msk.bf16.vlgmr.msra.gmra.mrb[12].mxu1 %vm470_vm0, %v782_v17 }
 0x2dc   : > { %2162 = vmatpush3.bf16.xpose.msra.mxu1 %v959_v26  ;;  %2163 = vmatprep.mubr.msk.bf16.mxu1 %vm2399_vm2, %v2398_v6 }
 0x2dd   : > { %2158 = vmatmul.mubr.msk.bf16.vlgmr.msra.gmra.mrb[20].mxu0 %vm470_vm0, %v782_v17  ;;  %2173 = vmatprep.subr.bf16.mxu1 %v2398_v6 }
 0x2de   : > { %2168 = vmatpush3.bf16.xpose.msra.mxu0 %v1002_v27  ;;  %2169 = vmatprep.mubr.msk.bf16.mxu0 %vm2399_vm2, %v2398_v6 }
 0x2df   : > { %2179 = vmatprep.subr.bf16.mxu0 %v2398_v6 }
 0x2e3   : > { %2164 = vmatmul.mubr.msk.bf16.vlgmr.msra.gmra.mrb[16].mxu1 %vm470_vm0, %v782_v17 }
 0x2e4   : > { %2174 = vmatpush3.bf16.xpose.msra.mxu1 %v1045_v30  ;;  %2175 = vmatprep.mubr.msk.bf16.mxu1 %vm2399_vm2, %v2398_v6 }
 0x2e5   : > { %2170 = vmatmul.mubr.msk.bf16.vlgmr.msra.gmra.mrb[24].mxu0 %vm470_vm0, %v782_v17  ;;  %2185 = vmatprep.subr.bf16.mxu1 %v2398_v6 }
 0x2e6   : > { %2180 = vmatpush3.bf16.xpose.msra.mxu0 %v1088_v31  ;;  %2181 = vmatprep.mubr.msk.bf16.mxu0 %vm2399_vm2, %v2398_v6 }
 0x2e7   : > { %2191 = vmatprep.subr.bf16.mxu0 %v2398_v6 }
 0x2eb   : > { %2176 = vmatmul.mubr.msk.bf16.vlgmr.msra.gmra.mrb[20].mxu1 %vm470_vm0, %v782_v17 }
 0x2ec   : > { %2187 = vmatprep.mubr.msk.bf16.mxu1 %vm2399_vm2, %v2398_v6 }
 0x2ed   : > { %2182 = vmatmul.mubr.msk.bf16.vlgmr.msra.gmra.mrb[28].mxu0 %vm470_vm0, %v782_v17 }
 0x2ee   : > { %2193 = vmatprep.mubr.msk.bf16.mxu0 %vm2399_vm2, %v2398_v6 }
 0x3a6   : > { %v823_v45 = vpop.f32.mrb[8].mxu1 }
 0x3a7   : > { %v1130_v46 = vmul.f32 0.17677669, %v823_v45  ;;  %v2141_v47 = vpop.f32.mrb[9].mxu1 }
 0x3a8   : > { %v866_v48 = vpop.f32.mrb[16].mxu0  ;;  %v826_v50 = vpop.f32.mrb[10].mxu1 }
 0x3a9   : > { %v1131_v51 = vmul.f32 0.17677669, %v866_v48  ;;  %v2681_v52 = vsel %vm1190_vm4, -inf, %v1130_v46  ;;  %v2142_v53 = vpop.f32.mrb[11].mxu1  ;;  %v2147_v54 = vpop.f32.mrb[17].mxu0  ;;  %vm1753_vm4 = vcmask 1045509  }
 0x3aa   : > { %v1207_v55 = vsel %vm1206_vm5, %v2681_v52, -inf  ;;  %v869_v56 = vpop.f32.mrb[18].mxu0  ;;  %v1189_v53 = vcombine.high %v1185_v18, %v1185_v18 }
 0x3ab   : > { %1208 = vmax.xlane.f32.xlu0 %v1207_v55  ;;  %v2685_v58 = vsel %vm1191_vm6, -inf, %v1131_v51  ;;  %v2148_v59 = vpop.f32.mrb[19].mxu0  ;;  %vm1759_vm6 = vcmask 1047559  }
 0x3ac   : > { %v1210_v63 = vsel %vm1206_vm5, %v2685_v58, -inf  ;;  %vm1197_vm12 = vcmp.ne.s32.totalorder %v1189_v53, 0 }
 0x3ae   : > { %v909_v62 = vpop.f32.mrb[12].mxu1 }
 0x3af   : > { %v1132_v0 = vmul.f32 0.17677669, %v909_v62  ;;  %1211 = vmax.xlane.f32.xlu0 %v1210_v63  ;;  %v2153_v1 = vpop.f32.mrb[13].mxu1 }
 0x3b0   : > { %v952_v2 = vpop.f32.mrb[20].mxu0  ;;  %v912_v3 = vpop.f32.mrb[14].mxu1 }
 0x3b1   : > { %v1133_v5 = vmul.f32 0.17677669, %v952_v2  ;;  %v2690_v7 = vsel %vm1192_vm7, -inf, %v1132_v0  ;;  %v2154_v8 = vpop.f32.mrb[15].mxu1  ;;  %v2159_v10 = vpop.f32.mrb[21].mxu0  ;;  %vm1817_vm7 = vcmask 31744  }
 0x3b2   : > { %v1213_v11 = vsel %vm1206_vm5, %v2690_v7, -inf  ;;  %v955_v12 = vpop.f32.mrb[22].mxu0 }
 0x3b3   : > { %1214 = vmax.xlane.f32.xlu1 %v1213_v11  ;;  %v2695_v16 = vsel %vm1193_vm8, -inf, %v1133_v5  ;;  %v2160_v17 = vpop.f32.mrb[23].mxu0 }
 0x3b4   : > { %v1216_v21 = vsel %vm1206_vm5, %v2695_v16, -inf }
 0x3b6   : > { %v995_v20 = vpop.f32.mrb[16].mxu1 }
 0x3b7   : > { %v1134_v22 = vmul.f32 0.17677669, %v995_v20  ;;  %1217 = vmax.xlane.f32.xlu1 %v1216_v21  ;;  %v2165_v23 = vpop.f32.mrb[17].mxu1 }
 0x3b8   : > { %v1038_v26 = vpop.f32.mrb[24].mxu0  ;;  %v998_v27 = vpop.f32.mrb[18].mxu1 }
 0x3b9   : > { %v1135_v30 = vmul.f32 0.17677669, %v1038_v26  ;;  %v2700_v31 = vsel %vm1194_vm9, -inf, %v1134_v22  ;;  %v2166_v32 = vpop.f32.mrb[19].mxu1  ;;  %v2171_v33 = vpop.f32.mrb[25].mxu0 }
 0x3ba   : > { %v1219_v34 = vsel %vm1206_vm5, %v2700_v31, -inf  ;;  %v1041_v35 = vpop.f32.mrb[26].mxu0 }
 0x3bb   : > { %1220 = vmax.xlane.f32.xlu0 %v1219_v34  ;;  %v2704_v37 = vsel %vm1195_vm10, -inf, %v1135_v30  ;;  %v2172_v39 = vpop.f32.mrb[27].mxu0 }
 0x3bc   : > { %v1222_v40 = vsel %vm1206_vm5, %v2704_v37, -inf }
 0x3bd   : > { %1223 = vmax.xlane.f32.xlu1 %v1222_v40 }
 0x3be   : > { %v1081_v41 = vpop.f32.mrb[20].mxu1 }
 0x3bf   : > { %v1136_v42 = vmul.f32 0.17677669, %v1081_v41  ;;  %v2177_v43 = vpop.f32.mrb[21].mxu1 }
 0x3c0   : > { %v1124_v44 = vpop.f32.mrb[28].mxu0  ;;  %v1084_v45 = vpop.f32.mrb[22].mxu1 }
 0x3c1   : > { %v2708_v46 = vsel %vm1196_vm11, -inf, %v1136_v42  ;;  %v2183_v47 = vpop.f32.mrb[29].mxu0  ;;  %v2178_v48 = vpop.f32.mrb[23].mxu1  ;;  %v1137_v54 = vmul.f32 0.17677669, %v1124_v44 }
 0x3c2   : > { %v1225_v49 = vsel %vm1206_vm5, %v2708_v46, -inf  ;;  %v1127_v50 = vpop.f32.mrb[30].mxu0 }
 0x3c3   : > { %1226 = vmax.xlane.f32.xlu0 %v1225_v49  ;;  %v2184_v51 = vpop.f32.mrb[31].mxu0  ;;  %v2718_v55 = vsel %vm1197_vm12, -inf, %v1137_v54 }
 0x3c4   : > { %v1228_v56 = vsel %vm1206_vm5, %v2718_v55, -inf }
 0x3ce   : > { %1363 = vrot.lane.b32.xlu1 %v2605_v13, %s2402_s21 }
 0x3d2   : > { %1412 = vrot.lane.b32.xlu1 %v2610_v15, %s2402_s21 }
 0x3d9   : > { %1312 = vrot.lane.b32.xlu0 %v2601_v9, %s2402_s21 }
 0x3f6   : > { %1229 = vmax.xlane.f32.xlu1 %v1228_v56 }
 0x407   : > { %1461 = vrot.lane.b32.xlu1 %v2616_v19, %s2402_s21 }
 0x438   : > { %v1209_v57 = vpop.xlane.xlu0 %1208 }
 0x439   : > { %v1231_v13 = vsub.f32 %v2681_v52, %v1209_v57 }
 0x43b   : > { %v1239_v59 = vmul.f32 1.442695, %v1231_v13 }
 0x43c   : > { %v1212_v15 = vpop.xlane.xlu0 %1211 }
 0x43d   : > { %2297 = vpow2.f32 %v1239_v59  ;;  %v1232_v9 = vsub.f32 %v2685_v58, %v1212_v15 }
 0x43f   : > { %v1241_v60 = vmul.f32 1.442695, %v1232_v9 }
 0x440   : > { %v1215_v61 = vpop.xlane.xlu1 %1214 }
 0x441   : > { %2299 = vpow2.f32 %v1241_v60  ;;  %v1233_v62 = vsub.f32 %v2690_v7, %v1215_v61 }
 0x443   : > { %v1243_v63 = vmul.f32 1.442695, %v1233_v62 }
 0x444   : > { %v1218_v0 = vpop.xlane.xlu1 %1217 }
 0x445   : > { %2301 = vpow2.f32 %v1243_v63  ;;  %v1234_v14 = vsub.f32 %v2695_v16, %v1218_v0 }
 0x447   : > { %v2727_v1 = vpop.eup %2297  ;;  %v1245_v18 = vmul.f32 1.442695, %v1234_v14 }
 0x448   : > { %v1255_v19 = vsel %vm1206_vm5, %v2727_v1, 0.0  ;;  %v1221_v3 = vpop.xlane.xlu0 %1220 }
 0x449   : > { %1256 = vadd.xlane.f32.xlu0 %v1255_v19  ;;  %v1235_v17 = vsub.f32 %v2700_v31, %v1221_v3  ;;  %2303 = vpow2.f32 %v1245_v18 }
 0x44a   : > { %v1224_v52 = vpop.xlane.xlu1 %1223 }
 0x44b   : > { %v2731_v2 = vpop.eup %2299  ;;  %v1236_v20 = vsub.f32 %v2704_v37, %v1224_v52  ;;  %v1247_v21 = vmul.f32 1.442695, %v1235_v17 }
 0x44c   : > { %v1258_v58 = vsel %vm1206_vm5, %v2731_v2, 0.0 }
 0x44d   : > { %1259 = vadd.xlane.f32.xlu1 %v1258_v58  ;;  %v1249_v22 = vmul.f32 1.442695, %v1236_v20  ;;  %2305 = vpow2.f32 %v1247_v21 }
 0x44e   : > { %v1364_v4 = vpop.permute.xlu1 %1363 }
 0x44f   : > { %v2735_v5 = vpop.eup %2301  ;;  %v1369_v7 = vsel %vm1318_vm13, %v1364_v4, 0  ;;  %2307 = vpow2.f32 %v1249_v22 }
 0x450   : > { %v1227_v8 = vpop.xlane.xlu0 %1226  ;;  %2192 = vmatpush3.bf16.msra.mxu0 %v1369_v7  ;;  %v1261_v10 = vsel %vm1206_vm5, %v2735_v5, 0.0 }
 0x451   : > { %1262 = vadd.xlane.f32.xlu0 %v1261_v10  ;;  %2203 = vmatprep.subr.bf16.mxu0 %v2398_v6  ;;  %v1237_v23 = vsub.f32 %v2708_v46, %v1227_v8 }
 0x452   : > { %v1413_v27 = vpop.permute.xlu1 %1412 }
 0x453   : > { %v1251_v26 = vmul.f32 1.442695, %v1237_v23 }
 0x454   : > { %v1313_v11 = vpop.permute.xlu0 %1312 }
 0x455   : > { %v1320_v12 = vsel %vm1318_vm13, %v1313_v11, 0  ;;  %2309 = vpow2.f32 %v1251_v26 }
 0x456   : > { %2186 = vmatpush3.bf16.msra.mxu1 %v1320_v12 }
 0x457   : > { %2197 = vmatprep.subr.bf16.mxu1 %v2398_v6 }
 0x45e   : > { %1559 = vrot.lane.b32.xlu1 %v2632_v25, %s2402_s21  ;;  %v2751_v25 = vpop.eup %2303 }
 0x45f   : > { %v1264_v16 = vsel %vm1206_vm5, %v2751_v25, 0.0 }
 0x467   : > { %1510 = vrot.lane.b32.xlu0 %v2629_v24, %s2402_s21  ;;  %v2753_v24 = vpop.eup %2305 }
 0x468   : > { %v2757_v30 = vpop.eup %2307  ;;  %v1267_v33 = vsel %vm1206_vm5, %v2753_v24, 0.0 }
 0x469   : > { %v1270_v34 = vsel %vm1206_vm5, %v2757_v30, 0.0  ;;  %v2764_v35 = vpop.eup %2309 }
 0x46a   : > { %v1273_v37 = vsel %vm1206_vm5, %v2764_v35, 0.0 }
 0x482   : > { %1265 = vadd.xlane.f32.xlu1 %v1264_v16 }
 0x483   : > { %v1230_v31 = vpop.xlane.xlu1 %1229 }
 0x484   : > { %v1238_v32 = vsub.f32 %v2718_v55, %v1230_v31 }
 0x486   : > { %v1253_v36 = vmul.f32 1.442695, %v1238_v32  ;;  %1268 = vadd.xlane.f32.xlu0 %v1267_v33  ;;  %1271 = vadd.xlane.f32.xlu1 %v1270_v34 }
 0x487   : > { %v1462_v41 = vpop.permute.xlu1 %1461 }
 0x488   : > { %2311 = vpow2.f32 %v1253_v36  ;;  %v1467_v56 = vsel %vm1318_vm13, %v1462_v41, 0 }
 0x48a   : > { %1274 = vadd.xlane.f32.xlu0 %v1273_v37 }
 0x492   : > { %v2768_v39 = vpop.eup %2311 }
 0x493   : > { %v1276_v40 = vsel %vm1206_vm5, %v2768_v39, 0.0  ;;  %vm1756_vm5 = vcmask 1046534  }
 0x494   : > { %1277 = vadd.xlane.f32.xlu1 %v1276_v40 }
 0x4a0   : > { %1608 = vrot.lane.b32.xlu0 %v2645_v28, %s2402_s21  ;;  %v1418_v28 = vsel %vm1318_vm13, %v1413_v27, 0 }
 0x4a5   : > { %1657 = vrot.lane.b32.xlu1 %v2648_v29, %s2402_s21 }
 0x4d6   : > { %v1257_v42 = vpop.xlane.xlu0 %1256 }
 0x4d7   : > { %2313 = vrcp.f32 %v1257_v42 }
 0x4da   : > { %v1260_v43 = vpop.xlane.xlu1 %1259 }
 0x4db   : > { %2315 = vrcp.f32 %v1260_v43  ;;  %v2295_v43 = vld [vmem:[%s2864_s8] sm:$0xff]  }
 0x4de   : > { %v1263_v44 = vpop.xlane.xlu0 %1262  ;;  %v1560_v9 = vpop.permute.xlu1 %1559 }
 0x4df   : > { %2317 = vrcp.f32 %v1263_v44  ;;  %v1565_v8 = vsel %vm1318_vm13, %v1560_v9, 0  ;;  %v2296_v44 = vld [vmem:[%s2864_s8 + $0x8] sm:$0xff]  }
 0x4e1   : > { %v2314_v45 = vpop.eup %2313 }
 0x4e2   : > { %v1280_v46 = vmul.f32 %v2314_v45, %v2727_v1  ;;  %v1511_v13 = vpop.permute.xlu0 %1510 }
 0x4e3   : > { %v1516_v15 = vsel %vm1318_vm13, %v1511_v13, 0 }
 0x4e4   : > { %v1295_v47 = vadd.f32 1e-08, %v1280_v46 }
 0x4e5   : > { %v2316_v48 = vpop.eup %2315 }
 0x4e6   : > { %v1282_v49 = vmul.f32 %v2316_v48, %v2731_v2  ;;  %v1303_v50 = vpack.c.bf16 %v1295_v47, %v1295_v47 }
 0x4e8   : > { %v1296_v51 = vadd.f32 1e-08, %v1282_v49  ;;  %2188 = vmatmul.mubr.msk.bf16.vlgmr.msra.gmra.mrb[24].mxu1 %vm1314_vm14, %v1303_v50 }
 0x4e9   : > { %v2318_v29 = vpop.eup %2317  ;;  %2198 = vmatpush3.bf16.msra.mxu1 %v1418_v28  ;;  %2199 = vmatprep.mubr.msk.bf16.mxu1 %vm2399_vm2, %v2398_v6 }
 0x4ea   : > { %v1827_v53 = vcombine.low %v1295_v47, %v1296_v51  ;;  %v1284_v54 = vmul.f32 %v2318_v29, %v2735_v5  ;;  %v1304_v55 = vpack.c.bf16 %v1296_v51, %v1296_v51  ;;  %2209 = vmatprep.subr.bf16.mxu1 %v2398_v6 }
 0x4ec   : > { %v1297_v57 = vadd.f32 1e-08, %v1284_v54  ;;  %2194 = vmatmul.mubr.msk.bf16.vlgmr.msra.gmra.mrb[32].mxu0 %vm1314_vm14, %v1304_v55  ;;  %v1837_v7 = vrot.slane %v1827_v53, %v2676_v38 }
 0x4ed   : > { %2204 = vmatpush3.bf16.msra.mxu0 %v1467_v56  ;;  %2205 = vmatprep.mubr.msk.bf16.mxu0 %vm2399_vm2, %v2398_v6 }
 0x4ee   : > { %v1305_v59 = vpack.c.bf16 %v1297_v57, %v1297_v57  ;;  %2215 = vmatprep.subr.bf16.mxu0 %v2398_v6 }
 0x4f0   : > { %2200 = vmatmul.mubr.msk.bf16.vlgmr.msra.gmra.mrb[28].mxu1 %vm1314_vm14, %v1305_v59 }
 0x4f1   : > { %2210 = vmatpush3.bf16.msra.mxu1 %v1516_v15  ;;  %2211 = vmatprep.mubr.msk.bf16.mxu1 %vm2399_vm2, %v2398_v6 }
 0x4f2   : > { %2221 = vmatprep.subr.bf16.mxu1 %v2398_v6 }
 0x50f   : > { %v1266_v60 = vpop.xlane.xlu1 %1265 }
 0x510   : > { %2319 = vrcp.f32 %v1266_v60 }
 0x513   : > { %v1269_v61 = vpop.xlane.xlu0 %1268  ;;  %v1272_v62 = vpop.xlane.xlu1 %1271 }
 0x514   : > { %2321 = vrcp.f32 %v1269_v61 }
 0x515   : > { %2323 = vrcp.f32 %v1272_v62 }
 0x517   : > { %v1275_v63 = vpop.xlane.xlu0 %1274 }
 0x518   : > { %2325 = vrcp.f32 %v1275_v63 }
 0x51a   : > { %v2320_v0 = vpop.eup %2319 }
 0x51b   : > { %v1286_v1 = vmul.f32 %v2320_v0, %v2751_v25  ;;  %v1609_v17 = vpop.permute.xlu0 %1608 }
 0x51c   : > { %v1614_v23 = vsel %vm1318_vm13, %v1609_v17, 0 }
 0x51d   : > { %v1298_v19 = vadd.f32 1e-08, %v1286_v1 }
 0x51e   : > { %v2322_v52 = vpop.eup %2321 }
 0x51f   : > { %v2324_v2 = vpop.eup %2323  ;;  %v1828_v3 = vcombine.low %v1297_v57, %v1298_v19  ;;  %v1288_v58 = vmul.f32 %v2322_v52, %v2753_v24  ;;  %v1306_v4 = vpack.c.bf16 %v1298_v19, %v1298_v19 }
 0x520   : > { %v1290_v5 = vmul.f32 %v2324_v2, %v2757_v30 }
 0x521   : > { %v1844_v10 = vrot.slane %v1828_v3, %v2676_v38  ;;  %v1299_v11 = vadd.f32 1e-08, %v1288_v58  ;;  %2206 = vmatmul.mubr.msk.bf16.vlgmr.msra.gmra.mrb[36].mxu0 %vm1314_vm14, %v1306_v4  ;;  %v1278_v12 = vpop.xlane.xlu1 %1277 }
 0x522   : > { %v2326_v14 = vpop.eup %2325  ;;  %2216 = vmatpush3.bf16.msra.mxu0 %v1565_v8  ;;  %2327 = vrcp.f32 %v1278_v12  ;;  %2217 = vmatprep.mubr.msk.bf16.mxu0 %vm2399_vm2, %v2398_v6  ;;  %v1300_v20 = vadd.f32 1e-08, %v1290_v5 }
 0x523   : > { %v1859_v18 = vcombine.low %v1837_v7, %v1844_v10  ;;  %v1292_v21 = vmul.f32 %v2326_v14, %v2764_v35  ;;  %v1307_v22 = vpack.c.bf16 %v1299_v11, %v1299_v11  ;;  %2227 = vmatprep.subr.bf16.mxu0 %v2398_v6 }
 0x524   : > { %v1308_v27 = vpack.c.bf16 %v1300_v20, %v1300_v20  ;;  %v1829_v32 = vcombine.low %v1299_v11, %v1300_v20 }
 0x525   : > { %2212 = vmatmul.mubr.msk.bf16.vlgmr.msra.gmra.mrb[32].mxu1 %vm1314_vm14, %v1307_v22  ;;  %v1658_v26 = vpop.permute.xlu1 %1657  ;;  %v1301_v25 = vadd.f32 1e-08, %v1292_v21  ;;  %v1867_v41 = vrot.slane %v1859_v18, %v2676_v38 }
 0x526   : > { %2222 = vmatpush3.bf16.msra.mxu1 %v1614_v23  ;;  %2223 = vmatprep.mubr.msk.bf16.mxu1 %vm2399_vm2, %v2398_v6  ;;  %v1663_v24 = vsel %vm1318_vm13, %v1658_v26, 0  ;;  %v1851_v36 = vrot.slane %v1829_v32, %v2676_v38 }
 0x527   : > { %2233 = vmatprep.subr.bf16.mxu1 %v2398_v6  ;;  %v1309_v16 = vpack.c.bf16 %v1301_v25, %v1301_v25 }
 0x529   : > { %2218 = vmatmul.mubr.msk.bf16.vlgmr.msra.gmra.mrb[40].mxu0 %vm1314_vm14, %v1308_v27 }
 0x52a   : > { %2228 = vmatpush3.bf16.msra.mxu0 %v1663_v24  ;;  %2229 = vmatprep.mubr.msk.bf16.mxu0 %vm2399_vm2, %v2398_v6 }
 0x52c   : > { %v2328_v30 = vpop.eup %2327 }
 0x52d   : > { %v1294_v31 = vmul.f32 %v2328_v30, %v2768_v39  ;;  %2224 = vmatmul.mubr.msk.bf16.vlgmr.msra.gmra.mrb[36].mxu1 %vm1314_vm14, %v1309_v16 }
 0x52e   : > { %2237 = vmatprep.mubr.msk.bf16.mxu1 %vm2399_vm2, %v2398_v6  ;;  %2234 = vmatpush3.bf16.msra.mxu1 %v2295_v43  ;;  %vm1747_vm2 = vcmask 1043459  }
 0x52f   : > { %v1302_v33 = vadd.f32 1e-08, %v1294_v31  ;;  %2235 = vmatprep.subr.bf16.mxu1 %v2398_v6 }
 0x531   : > { %v1830_v34 = vcombine.low %v1301_v25, %v1302_v33  ;;  %v1310_v35 = vpack.c.bf16 %v1302_v33, %v1302_v33 }
 0x532   : > { %2236 = vmatpush3.bf16.msra.mxu1 %v2296_v44  ;;  %v2035_v44 = vld [vmem:[%s2865_s9] ss:$0 sm:$0xff] }
 0x533   : > { %v1858_v37 = vrot.slane %v1830_v34, %v2676_v38  ;;  %2230 = vmatmul.mubr.msk.bf16.vlgmr.msra.gmra.mrb[44].mxu0 %vm1314_vm14, %v1310_v35 }
 0x535   : > { %v1860_v40 = vcombine.low %v1851_v36, %v1858_v37 }
 0x537   : > { %v1874_v39 = vrot.slane %v1860_v40, %v2676_v38 }
 0x539   : > { %v1875_v42 = vcombine.low %v1867_v41, %v1874_v39 }
 0x53b   : > { %1877 = vst.msk [vmem:[%s433_s14] sm:$0xff] %vm1314_vm14, %v1875_v42 }
 0x5bb   : > { %v1356_v38 = vpop.f32.mrb[24].mxu1 }
 0x5bc   : > { %v2189_v45 = vpop.f32.mrb[25].mxu1  ;;  %v1705_v49 = vpack.c.bf16 %v1356_v38, %v1356_v38 }
 0x5bd   : > { %v1359_v46 = vpop.f32.mrb[26].mxu1 }
 0x5be   : > { %v2190_v47 = vpop.f32.mrb[27].mxu1  ;;  %v1732_v55 = vunpack.c.l.b16 %v1705_v49 }
 0x5bf   : > { %v1405_v48 = vpop.f32.mrb[32].mxu0 }
 0x5c0   : > { %v1706_v50 = vpack.c.bf16 %v1405_v48, %v1405_v48  ;;  %v2195_v28 = vpop.f32.mrb[33].mxu0 }
 0x5c1   : > { %v1408_v51 = vpop.f32.mrb[34].mxu0 }
 0x5c2   : > { %v1733_v29 = vunpack.c.l.b16 %v1706_v50  ;;  %v2196_v53 = vpop.f32.mrb[35].mxu0 }
 0x5c3   : > { %v1454_v54 = vpop.f32.mrb[28].mxu1 }
 0x5c4   : > { %v1740_v6 = vrot.slane %v1733_v29, 7  ;;  %v1707_v56 = vpack.c.bf16 %v1454_v54, %v1454_v54  ;;  %v2201_v57 = vpop.f32.mrb[29].mxu1 }
 0x5c5   : > { %v1457_v13 = vpop.f32.mrb[30].mxu1 }
 0x5c6   : > { %v1742_v59 = vsel %vm1741_vm15, %v1740_v6, %v1732_v55  ;;  %v1734_v15 = vunpack.c.l.b16 %v1707_v56  ;;  %v2202_v9 = vpop.f32.mrb[31].mxu1 }
 0x5c8   : > { %v1743_v60 = vrot.slane %v1734_v15, 6 }
 0x5ca   : > { %v1745_v61 = vsel %vm1744_vm1, %v1743_v60, %v1742_v59 }
 0x5f4   : > { %v1503_v62 = vpop.f32.mrb[36].mxu0 }
 0x5f5   : > { %v1708_v63 = vpack.c.bf16 %v1503_v62, %v1503_v62  ;;  %v2207_v0 = vpop.f32.mrb[37].mxu0 }
 0x5f6   : > { %v1506_v1 = vpop.f32.mrb[38].mxu0 }
 0x5f7   : > { %v1735_v19 = vunpack.c.l.b16 %v1708_v63  ;;  %v2208_v52 = vpop.f32.mrb[39].mxu0 }
 0x5f8   : > { %v1552_v2 = vpop.f32.mrb[32].mxu1 }
 0x5f9   : > { %v1746_v3 = vrot.slane %v1735_v19, 5  ;;  %v1709_v58 = vpack.c.bf16 %v1552_v2, %v1552_v2  ;;  %v2213_v4 = vpop.f32.mrb[33].mxu1 }
 0x5fa   : > { %v1555_v5 = vpop.f32.mrb[34].mxu1 }
 0x5fb   : > { %v1748_v7 = vsel %vm1747_vm2, %v1746_v3, %v1745_v61  ;;  %v1736_v8 = vunpack.c.l.b16 %v1709_v58  ;;  %v2214_v10 = vpop.f32.mrb[35].mxu1 }
 0x5fc   : > { %v1601_v11 = vpop.f32.mrb[40].mxu0 }
 0x5fd   : > { %v1749_v12 = vrot.slane %v1736_v8, 4  ;;  %v1710_v14 = vpack.c.bf16 %v1601_v11, %v1601_v11  ;;  %v2219_v17 = vpop.f32.mrb[41].mxu0 }
 0x5fe   : > { %v1604_v18 = vpop.f32.mrb[42].mxu0 }
 0x5ff   : > { %v1751_v20 = vsel %vm1750_vm3, %v1749_v12, %v1748_v7  ;;  %v1737_v21 = vunpack.c.l.b16 %v1710_v14  ;;  %v2220_v22 = vpop.f32.mrb[43].mxu0 }
 0x600   : > { %v1650_v23 = vpop.f32.mrb[36].mxu1 }
 0x601   : > { %v1752_v26 = vrot.slane %v1737_v21, 3  ;;  %v1711_v25 = vpack.c.bf16 %v1650_v23, %v1650_v23  ;;  %v2225_v27 = vpop.f32.mrb[37].mxu1 }
 0x602   : > { %v1653_v24 = vpop.f32.mrb[38].mxu1 }
 0x603   : > { %v1754_v16 = vsel %vm1753_vm4, %v1752_v26, %v1751_v20  ;;  %v1738_v30 = vunpack.c.l.b16 %v1711_v25  ;;  %v2226_v31 = vpop.f32.mrb[39].mxu1 }
 0x605   : > { %v1755_v32 = vrot.slane %v1738_v30, 2 }
 0x606   : > { %v1699_v33 = vpop.f32.mrb[44].mxu0 }
 0x607   : > { %v1757_v34 = vsel %vm1756_vm5, %v1755_v32, %v1754_v16  ;;  %v1712_v35 = vpack.c.bf16 %v1699_v33, %v1699_v33  ;;  %v2231_v36 = vpop.f32.mrb[45].mxu0 }
 0x608   : > { %v1702_v37 = vpop.f32.mrb[46].mxu0 }
 0x609   : > { %v1739_v40 = vunpack.c.l.b16 %v1712_v35  ;;  %v2232_v41 = vpop.f32.mrb[47].mxu0 }
 0x60b   : > { %v1758_v39 = vrot.slane %v1739_v40, 1 }
 0x60d   : > { %v1760_v42 = vsel %vm1759_vm6, %v1758_v39, %v1757_v34 }
 0x60e   : > { %v1761_v43 = vpack.c.b16 %v1760_v42, %v1760_v42 }
 0x610   : > { %2238 = vmatmul.mubr.msk.bf16.vlgmr.msra.gmra.mrb[40].mxu1 %vm470_vm0, %v1761_v43 }
 0x6e3   : > { %v1811_v38 = vpop.f32.mrb[40].mxu1 }
 0x6e4   : > { %v1812_v45 = vadd.f32 %v2035_v44, %v1811_v38  ;;  %v2239_v46 = vpop.f32.mrb[41].mxu1 }
 0x6e5   : > { %v1814_v47 = vpop.f32.mrb[42].mxu1 }
 0x6e6   : > { %1818 = vst.msk [vmem:[%s429_s30] sm:$0xff] %vm1817_vm7, %v1812_v45  ;;  %v2240_v48 = vpop.f32.mrb[43].mxu1 }
 0x6e7 PF: > { %p22_p8 = scmp.ge.s32.totalorder %s2485_s22, 4   ;;  %s2871_s17 = smov %s2385_s18 }
 0x6e8   : > { %s2872_s18 = smov %s2389_s19  ;;  %s2873_s19 = smov %s2495_s25 }
 0x6e9   : > { %s2874_s20 = smov %s2485_s22  ;;  %24 = sbr.rel (!%p22_p8) target bundleno = 3 (0x3), region = 115 }
 0x6f0   :  { %1911 = vsyncpa [#allocation3], 1 }
 0x6f1   :  { %1913 = vsyncpa [#allocation3 + $0x1], 1 }

</bundles_post_ra>
